<compile_context>
chip_gen: v7x
topology: tpu7x:2x2x1
jax: 0.10.0
libtpu: 0.0.40
codegen_flags: <defaults>
</compile_context>

<pallas_src>
import functools

import jax
import jax.numpy as jnp
from jax.experimental import pallas as pl
from jax.experimental.pallas import tpu as pltpu


_STRIDES = (1, 2, 2, 2)
_K = 3  # conv kernel size


# --------------------------------------------------------------- epilogue ----

def _gelu_tanh(x):
    # tanh-approx GELU: one EUP tanh + a few VPU ops per element.
    c = 0.7978845608028654  # sqrt(2/pi)
    return 0.5 * x * (1.0 + jnp.tanh(c * (x + 0.044715 * (x * x * x))))


# ----------------------------------------------------------------- kernel ----

def _conv_gelu_layer(src_ref, w_ref, b_ref, *, stride, t_out, folded):
    """One Conv1d(k=3, stride, no pad) + bias + GELU.

    src_ref : (t_in, ci)            f32 (VMEM block ref or scratch ref)
    w_ref   : (3*ci, co) if folded  bf16 flattened (tap-major) weights
              (3, ci, co) otherwise
    b_ref   : (1, co)               f32
    returns : (t_out, co)           f32
    """
    def tap(k):
        idx = pl.ds(k, t_out) if stride == 1 else pl.ds(k, t_out, stride)
        return src_ref[idx, :].astype(jnp.bfloat16)

    if folded:
        # Single MXU dot with K = 3*ci (lane-aligned concat of the 3 taps).
        xc = jnp.concatenate([tap(k) for k in range(_K)], axis=-1)
        acc = jnp.dot(xc, w_ref[...], preferred_element_type=jnp.float32)
    else:
        # ci not a multiple of 128 (e.g. idim = 80): 3 per-tap dots.
        acc = jnp.dot(tap(0), w_ref[0], preferred_element_type=jnp.float32)
        for k in range(1, _K):
            acc = acc + jnp.dot(tap(k), w_ref[k],
                                preferred_element_type=jnp.float32)

    return _gelu_tanh(acc + b_ref[...])


def _fused_kernel(x_ref, w1, b1, w2, b2, w3, b3, w4, b4, o_ref,
                  h1, h2, h3, *, t_outs, folded):
    """Whole 4-layer conv stack for one batch element.

    x_ref    : (T, idim)    f32
    w*/b*    : resident weight / bias tiles (constant index maps)
    o_ref    : (t4, odim)   output block
    h1/h2/h3 : f32 VMEM scratch for the intermediate activations
    """
    t1, t2, t3, t4 = t_outs
    h1[...] = _conv_gelu_layer(x_ref, w1, b1, stride=_STRIDES[0],
                               t_out=t1, folded=folded[0])
    h2[...] = _conv_gelu_layer(h1, w2, b2, stride=_STRIDES[1],
                               t_out=t2, folded=folded[1])
    h3[...] = _conv_gelu_layer(h2, w3, b3, stride=_STRIDES[2],
                               t_out=t3, folded=folded[2])
    o_ref[...] = _conv_gelu_layer(h3, w4, b4, stride=_STRIDES[3],
                                  t_out=t4, folded=folded[3]).astype(o_ref.dtype)


# --------------------------------------------------------------- wrappers ----

def _conv_out_len(t_in, stride):
    return (t_in - _K) // stride + 1


def _vmem_limit_bytes(block_bytes):
    # Double-buffered operands + headroom; never request more than 48 MiB so
    # v7x (64 MiB physical VMEM) keeps room for DMA double-buffering, bias,
    # semaphores and internal scratch.
    need = 2 * block_bytes + (8 << 20)
    return int(min(max(need, 32 << 20), 48 << 20))


def aslp_conv1d_subsampling8(params, x):
    """Forward of ASLPConv1dSubsampling8: (B, T, idim) -> (B, T', odim).

    The torch transpose(1,2) pair around the NCL Conv1d stack is folded into
    this channel-last formulation; the math is identical.
    """
    B, T, c_in = x.shape

    # Channel dims per layer and output time lengths.
    c_dims = [c_in]
    for i in range(4):
        k, ci, co = params[f"w{i}"].shape
        assert k == _K and ci == c_dims[-1], (params[f"w{i}"].shape, c_dims)
        c_dims.append(co)
    odim = c_dims[-1]

    t_ins = [T]
    for s in _STRIDES:
        t_ins.append(_conv_out_len(t_ins[-1], s))
    t_outs = tuple(t_ins[1:])
    assert t_outs[-1] >= 1, t_outs
    # Strided tap reads must stay in bounds (VMEM refs have no runtime check).
    for i, s in enumerate(_STRIDES):
        assert (_K - 1) + s * (t_ins[i + 1] - 1) <= t_ins[i] - 1

    # Fold the 3 taps into one K=3*Cin dot only when Cin is lane-aligned.
    folded = tuple(c_dims[i] % 128 == 0 for i in range(4))

    # Weights in bf16 (MXU operands), biases in f32; constant index maps keep
    # them resident in VMEM across the whole batch grid.
    w_args, b_args, w_specs, b_specs = [], [], [], []
    for i in range(4):
        ci, co = c_dims[i], c_dims[i + 1]
        w = params[f"w{i}"].astype(jnp.bfloat16)            # (3, ci, co)
        if folded[i]:
            w = w.reshape(3 * ci, co)                       # tap-major rows
            w_specs.append(pl.BlockSpec((3 * ci, co), lambda b: (0, 0)))
        else:
            w_specs.append(pl.BlockSpec((_K, ci, co), lambda b: (0, 0, 0)))
        w_args.append(w)
        b_args.append(params[f"b{i}"].reshape(1, co).astype(jnp.float32))
        b_specs.append(pl.BlockSpec((1, co), lambda b: (0, 0)))

    in_specs = [pl.BlockSpec((None, T, c_in), lambda b: (b, 0, 0))]
    flat_args = [x]
    for i in range(4):
        in_specs += [w_specs[i], b_specs[i]]
        flat_args += [w_args[i], b_args[i]]

    out_dtype = x.dtype
    itemsize = jnp.dtype(out_dtype).itemsize
    block_bytes = (T * c_in * jnp.dtype(x.dtype).itemsize
                   + sum(int(w.size) * 2 for w in w_args)
                   + sum(int(b.size) * 4 for b in b_args)
                   + t_outs[-1] * odim * itemsize
                   + sum(t_outs[i] * c_dims[i + 1] * 4 for i in range(3)))

    kernel = functools.partial(_fused_kernel, t_outs=t_outs, folded=folded)

    return pl.pallas_call(
        kernel,
        out_shape=jax.ShapeDtypeStruct((B, t_outs[-1], odim), out_dtype),
        grid_spec=pltpu.PrefetchScalarGridSpec(
            num_scalar_prefetch=0,
            grid=(B,),
            in_specs=in_specs,
            out_specs=pl.BlockSpec((None, t_outs[-1], odim),
                                   lambda b: (b, 0, 0)),
            scratch_shapes=[
                pltpu.VMEM((t_outs[0], c_dims[1]), jnp.float32),
                pltpu.VMEM((t_outs[1], c_dims[2]), jnp.float32),
                pltpu.VMEM((t_outs[2], c_dims[3]), jnp.float32),
            ],
        ),
        compiler_params=pltpu.CompilerParams(
            dimension_semantics=("parallel",),
            vmem_limit_bytes=_vmem_limit_bytes(block_bytes),
        ),
    )(*flat_args)


def init_params(key, idim, odim, scale=0.1):
    ks = jax.random.split(key, 8)
    dims = [(idim, odim), (odim, odim), (odim, odim), (odim, odim)]
    params = {}
    for i, (ci, co) in enumerate(dims):
        params[f"w{i}"] = scale * jax.random.normal(ks[2 * i], (_K, ci, co),
                                                    jnp.float32)
        params[f"b{i}"] = scale * jax.random.normal(ks[2 * i + 1], (co,),
                                                    jnp.float32)
    return params


# --------------------------------------------------------- plain-JAX check ---

def _conv1d_gelu_ref(x, w_kio, b, stride, cast_bf16):
    K, _, c_out = w_kio.shape
    t_out = (x.shape[1] - K) // stride + 1
    acc = jnp.zeros((x.shape[0], t_out, c_out), jnp.float32)
    for k in range(K):
        xk = x[:, k:k + stride * (t_out - 1) + 1:stride, :]
        wk = w_kio[k]
        if cast_bf16:
            xk = xk.astype(jnp.bfloat16)
            wk = wk.astype(jnp.bfloat16)
        acc = acc + jnp.einsum("btc,cd->btd", xk, wk,
                               preferred_element_type=jnp.float32)
    return _gelu_tanh(acc + b[None, None, :].astype(jnp.float32))


def _forward_ref(params, x, cast_bf16):
    h = x.astype(jnp.float32)
    for i, s in enumerate(_STRIDES):
        h = _conv1d_gelu_ref(h, params[f"w{i}"], params[f"b{i}"], s, cast_bf16)
    return h


# ---------------------------------------------------------------------- main -

if __name__ == "__main__":
    key = jax.random.PRNGKey(0)
    B, T, IDIM, ODIM = 2, 64, 80, 128   # small, module-consistent shapes

    kp, kx = jax.random.split(key)
    params = init_params(kp, IDIM, ODIM)
    x = jax.random.normal(kx, (B, T, IDIM), jnp.float32)

    fwd = jax.jit(aslp_conv1d_subsampling8)
    y = jax.block_until_ready(fwd(params, x))

    # T = 64 -> 62 (k3,s1) -> 30 (k3,s2) -> 14 (k3,s2) -> 6 (k3,s2)
    assert y.shape == (B, 6, ODIM), y.shape
    assert bool(jnp.all(jnp.isfinite(y)))

    # Tight check vs a reference that mirrors the kernel numerics (bf16 MXU
    # operands, f32 accumulation / intermediates, tanh GELU): this catches
    # mis-indexed taps or a dropped bias.
    y_mirror = _forward_ref(params, x, cast_bf16=True)
    err_m = float(jnp.max(jnp.abs(y.astype(jnp.float32) - y_mirror)))
    ref_m = float(jnp.max(jnp.abs(y_mirror)))
    assert err_m <= 2e-2 * ref_m + 1e-3, ("mirror-check", err_m, ref_m)

    # Looser design check vs a full-f32 reference (covers the compounded bf16
    # operand rounding across the 4 layers).
    y_f32 = _forward_ref(params, x, cast_bf16=False)
    err_f = float(jnp.max(jnp.abs(y.astype(jnp.float32) - y_f32)))
    ref_f = float(jnp.max(jnp.abs(y_f32)))
    assert err_f <= 6e-2 * ref_f + 1e-2, ("f32-check", err_f, ref_f)

    print("KERNEL_OK")
</pallas_src>

<mosaic_0001>
module attributes {stable_mosaic.version = 11 : i64} {
  func.func @_fused_kernel(%arg0: i32, %arg1: memref<1x64x80xf32, #tpu.memory_space<vmem>>, %arg2: memref<3x80x128xbf16, #tpu.memory_space<vmem>>, %arg3: memref<1x128xf32, #tpu.memory_space<vmem>>, %arg4: memref<384x128xbf16, #tpu.memory_space<vmem>>, %arg5: memref<1x128xf32, #tpu.memory_space<vmem>>, %arg6: memref<384x128xbf16, #tpu.memory_space<vmem>>, %arg7: memref<1x128xf32, #tpu.memory_space<vmem>>, %arg8: memref<384x128xbf16, #tpu.memory_space<vmem>>, %arg9: memref<1x128xf32, #tpu.memory_space<vmem>>, %arg10: memref<1x6x128xf32, #tpu.memory_space<vmem>>, %arg11: memref<62x128xf32, #tpu.memory_space<vmem>>, %arg12: memref<30x128xf32, #tpu.memory_space<vmem>>, %arg13: memref<14x128xf32, #tpu.memory_space<vmem>>) attributes {dimension_semantics = [#tpu.dimension_semantics<parallel>], iteration_bounds = array<i64: 2>, scalar_prefetch = 0 : i64, scratch_operands = 3 : i64, tpu.core_type = #tpu.core_type<tc>, window_params = [{transform_indices = @transform_0, window_bounds = array<i64: 1, 64, 80>}, {pipeline_mode = #tpu.pipeline_mode<synchronous>, transform_indices = @transform_1, window_bounds = array<i64: 3, 80, 128>}, {pipeline_mode = #tpu.pipeline_mode<synchronous>, transform_indices = @transform_2, window_bounds = array<i64: 1, 128>}, {pipeline_mode = #tpu.pipeline_mode<synchronous>, transform_indices = @transform_3, window_bounds = array<i64: 384, 128>}, {pipeline_mode = #tpu.pipeline_mode<synchronous>, transform_indices = @transform_4, window_bounds = array<i64: 1, 128>}, {pipeline_mode = #tpu.pipeline_mode<synchronous>, transform_indices = @transform_5, window_bounds = array<i64: 384, 128>}, {pipeline_mode = #tpu.pipeline_mode<synchronous>, transform_indices = @transform_6, window_bounds = array<i64: 1, 128>}, {pipeline_mode = #tpu.pipeline_mode<synchronous>, transform_indices = @transform_7, window_bounds = array<i64: 384, 128>}, {pipeline_mode = #tpu.pipeline_mode<synchronous>, transform_indices = @transform_8, window_bounds = array<i64: 1, 128>}, {transform_indices = @transform_9, window_bounds = array<i64: 1, 6, 128>}]} {
    %c0 = arith.constant 0 : index
    %c0_0 = arith.constant 0 : index
    %c0_1 = arith.constant 0 : index
    %0 = vector.load %arg1[%c0, %c0_0, %c0_1] : memref<1x64x80xf32, #tpu.memory_space<vmem>>, vector<1x62x80xf32>
    %1 = vector.shape_cast %0 : vector<1x62x80xf32> to vector<62x80xf32>
    %2 = arith.truncf %1 : vector<62x80xf32> to vector<62x80xbf16>
    %c0_2 = arith.constant 0 : index
    %c0_3 = arith.constant 0 : index
    %c0_4 = arith.constant 0 : index
    %3 = vector.load %arg2[%c0_2, %c0_3, %c0_4] : memref<3x80x128xbf16, #tpu.memory_space<vmem>>, vector<1x80x128xbf16>
    %4 = vector.shape_cast %3 : vector<1x80x128xbf16> to vector<80x128xbf16>
    %cst = arith.constant dense<0.000000e+00> : vector<62x128xf32>
    %5 = tpu.matmul %2, %4, %cst {dimension_numbers = #tpu.dot_dimension_numbers<[1], [0], [0], [1], [0, 0, 1, 1], [], []>} : vector<62x80xbf16>, vector<80x128xbf16>, vector<62x128xf32> -> vector<62x128xf32>
    %c0_5 = arith.constant 0 : index
    %c1 = arith.constant 1 : index
    %c0_6 = arith.constant 0 : index
    %6 = vector.load %arg1[%c0_5, %c1, %c0_6] : memref<1x64x80xf32, #tpu.memory_space<vmem>>, vector<1x62x80xf32>
    %7 = vector.shape_cast %6 : vector<1x62x80xf32> to vector<62x80xf32>
    %8 = arith.truncf %7 : vector<62x80xf32> to vector<62x80xbf16>
    %c1_7 = arith.constant 1 : index
    %c0_8 = arith.constant 0 : index
    %c0_9 = arith.constant 0 : index
    %9 = vector.load %arg2[%c1_7, %c0_8, %c0_9] : memref<3x80x128xbf16, #tpu.memory_space<vmem>>, vector<1x80x128xbf16>
    %10 = vector.shape_cast %9 : vector<1x80x128xbf16> to vector<80x128xbf16>
    %cst_10 = arith.constant dense<0.000000e+00> : vector<62x128xf32>
    %11 = tpu.matmul %8, %10, %cst_10 {dimension_numbers = #tpu.dot_dimension_numbers<[1], [0], [0], [1], [0, 0, 1, 1], [], []>} : vector<62x80xbf16>, vector<80x128xbf16>, vector<62x128xf32> -> vector<62x128xf32>
    %12 = arith.addf %5, %11 : vector<62x128xf32>
    %c0_11 = arith.constant 0 : index
    %c2 = arith.constant 2 : index
    %c0_12 = arith.constant 0 : index
    %13 = vector.load %arg1[%c0_11, %c2, %c0_12] : memref<1x64x80xf32, #tpu.memory_space<vmem>>, vector<1x62x80xf32>
    %14 = vector.shape_cast %13 : vector<1x62x80xf32> to vector<62x80xf32>
    %15 = arith.truncf %14 : vector<62x80xf32> to vector<62x80xbf16>
    %c2_13 = arith.constant 2 : index
    %c0_14 = arith.constant 0 : index
    %c0_15 = arith.constant 0 : index
    %16 = vector.load %arg2[%c2_13, %c0_14, %c0_15] : memref<3x80x128xbf16, #tpu.memory_space<vmem>>, vector<1x80x128xbf16>
    %17 = vector.shape_cast %16 : vector<1x80x128xbf16> to vector<80x128xbf16>
    %cst_16 = arith.constant dense<0.000000e+00> : vector<62x128xf32>
    %18 = tpu.matmul %15, %17, %cst_16 {dimension_numbers = #tpu.dot_dimension_numbers<[1], [0], [0], [1], [0, 0, 1, 1], [], []>} : vector<62x80xbf16>, vector<80x128xbf16>, vector<62x128xf32> -> vector<62x128xf32>
    %19 = arith.addf %12, %18 : vector<62x128xf32>
    %c0_17 = arith.constant 0 : index
    %c0_18 = arith.constant 0 : index
    %20 = vector.load %arg3[%c0_17, %c0_18] : memref<1x128xf32, #tpu.memory_space<vmem>>, vector<1x128xf32>
    %21 = vector.broadcast %20 : vector<1x128xf32> to vector<62x128xf32>
    %22 = arith.addf %19, %21 : vector<62x128xf32>
    %cst_19 = arith.constant 5.000000e-01 : f32
    %23 = vector.broadcast %cst_19 : f32 to vector<62x128xf32>
    %24 = arith.mulf %23, %22 : vector<62x128xf32>
    %25 = arith.mulf %22, %22 : vector<62x128xf32>
    %26 = arith.mulf %25, %22 : vector<62x128xf32>
    %cst_20 = arith.constant 4.471500e-02 : f32
    %27 = vector.broadcast %cst_20 : f32 to vector<62x128xf32>
    %28 = arith.mulf %27, %26 : vector<62x128xf32>
    %29 = arith.addf %22, %28 : vector<62x128xf32>
    %cst_21 = arith.constant 0.797884583 : f32
    %30 = vector.broadcast %cst_21 : f32 to vector<62x128xf32>
    %31 = arith.mulf %30, %29 : vector<62x128xf32>
    %32 = math.tanh %31 : vector<62x128xf32>
    %cst_22 = arith.constant 1.000000e+00 : f32
    %33 = vector.broadcast %cst_22 : f32 to vector<62x128xf32>
    %34 = arith.addf %33, %32 : vector<62x128xf32>
    %35 = arith.mulf %24, %34 : vector<62x128xf32>
    %c0_23 = arith.constant 0 : index
    %c0_24 = arith.constant 0 : index
    %36 = vector.load %arg11[%c0_23, %c0_24] : memref<62x128xf32, #tpu.memory_space<vmem>>, vector<62x128xf32>
    tpu.vector_store %arg11[%c0_23, %c0_24], %35 {strides = array<i32>} : memref<62x128xf32, #tpu.memory_space<vmem>>, vector<62x128xf32>,
    %c0_25 = arith.constant 0 : index
    %c0_26 = arith.constant 0 : index
    %37 = tpu.strided_load %arg11[%c0_25, %c0_26] {strides = array<i32: 2, 1>} : memref<62x128xf32, #tpu.memory_space<vmem>>, vector<30x128xf32>
    %38 = arith.truncf %37 : vector<30x128xf32> to vector<30x128xbf16>
    %c1_27 = arith.constant 1 : index
    %c0_28 = arith.constant 0 : index
    %39 = tpu.strided_load %arg11[%c1_27, %c0_28] {strides = array<i32: 2, 1>} : memref<62x128xf32, #tpu.memory_space<vmem>>, vector<30x128xf32>
    %40 = arith.truncf %39 : vector<30x128xf32> to vector<30x128xbf16>
    %c2_29 = arith.constant 2 : index
    %c0_30 = arith.constant 0 : index
    %41 = tpu.strided_load %arg11[%c2_29, %c0_30] {strides = array<i32: 2, 1>} : memref<62x128xf32, #tpu.memory_space<vmem>>, vector<30x128xf32>
    %42 = arith.truncf %41 : vector<30x128xf32> to vector<30x128xbf16>
    %43 = tpu.concatenate %38, %40, %42 in 1 : vector<30x128xbf16>, vector<30x128xbf16>, vector<30x128xbf16> -> vector<30x384xbf16>
    %c0_31 = arith.constant 0 : index
    %c0_32 = arith.constant 0 : index
    %44 = vector.load %arg4[%c0_31, %c0_32] : memref<384x128xbf16, #tpu.memory_space<vmem>>, vector<384x128xbf16>
    %cst_33 = arith.constant dense<0.000000e+00> : vector<30x128xf32>
    %45 = tpu.matmul %43, %44, %cst_33 {dimension_numbers = #tpu.dot_dimension_numbers<[1], [0], [0], [1], [0, 0, 1, 1], [], []>} : vector<30x384xbf16>, vector<384x128xbf16>, vector<30x128xf32> -> vector<30x128xf32>
    %c0_34 = arith.constant 0 : index
    %c0_35 = arith.constant 0 : index
    %46 = vector.load %arg5[%c0_34, %c0_35] : memref<1x128xf32, #tpu.memory_space<vmem>>, vector<1x128xf32>
    %47 = vector.broadcast %46 : vector<1x128xf32> to vector<30x128xf32>
    %48 = arith.addf %45, %47 : vector<30x128xf32>
    %cst_36 = arith.constant 5.000000e-01 : f32
    %49 = vector.broadcast %cst_36 : f32 to vector<30x128xf32>
    %50 = arith.mulf %49, %48 : vector<30x128xf32>
    %51 = arith.mulf %48, %48 : vector<30x128xf32>
    %52 = arith.mulf %51, %48 : vector<30x128xf32>
    %cst_37 = arith.constant 4.471500e-02 : f32
    %53 = vector.broadcast %cst_37 : f32 to vector<30x128xf32>
    %54 = arith.mulf %53, %52 : vector<30x128xf32>
    %55 = arith.addf %48, %54 : vector<30x128xf32>
    %cst_38 = arith.constant 0.797884583 : f32
    %56 = vector.broadcast %cst_38 : f32 to vector<30x128xf32>
    %57 = arith.mulf %56, %55 : vector<30x128xf32>
    %58 = math.tanh %57 : vector<30x128xf32>
    %cst_39 = arith.constant 1.000000e+00 : f32
    %59 = vector.broadcast %cst_39 : f32 to vector<30x128xf32>
    %60 = arith.addf %59, %58 : vector<30x128xf32>
    %61 = arith.mulf %50, %60 : vector<30x128xf32>
    %c0_40 = arith.constant 0 : index
    %c0_41 = arith.constant 0 : index
    %62 = vector.load %arg12[%c0_40, %c0_41] : memref<30x128xf32, #tpu.memory_space<vmem>>, vector<30x128xf32>
    tpu.vector_store %arg12[%c0_40, %c0_41], %61 {strides = array<i32>} : memref<30x128xf32, #tpu.memory_space<vmem>>, vector<30x128xf32>,
    %c0_42 = arith.constant 0 : index
    %c0_43 = arith.constant 0 : index
    %63 = tpu.strided_load %arg12[%c0_42, %c0_43] {strides = array<i32: 2, 1>} : memref<30x128xf32, #tpu.memory_space<vmem>>, vector<14x128xf32>
    %64 = arith.truncf %63 : vector<14x128xf32> to vector<14x128xbf16>
    %c1_44 = arith.constant 1 : index
    %c0_45 = arith.constant 0 : index
    %65 = tpu.strided_load %arg12[%c1_44, %c0_45] {strides = array<i32: 2, 1>} : memref<30x128xf32, #tpu.memory_space<vmem>>, vector<14x128xf32>
    %66 = arith.truncf %65 : vector<14x128xf32> to vector<14x128xbf16>
    %c2_46 = arith.constant 2 : index
    %c0_47 = arith.constant 0 : index
    %67 = tpu.strided_load %arg12[%c2_46, %c0_47] {strides = array<i32: 2, 1>} : memref<30x128xf32, #tpu.memory_space<vmem>>, vector<14x128xf32>
    %68 = arith.truncf %67 : vector<14x128xf32> to vector<14x128xbf16>
    %69 = tpu.concatenate %64, %66, %68 in 1 : vector<14x128xbf16>, vector<14x128xbf16>, vector<14x128xbf16> -> vector<14x384xbf16>
    %c0_48 = arith.constant 0 : index
    %c0_49 = arith.constant 0 : index
    %70 = vector.load %arg6[%c0_48, %c0_49] : memref<384x128xbf16, #tpu.memory_space<vmem>>, vector<384x128xbf16>
    %cst_50 = arith.constant dense<0.000000e+00> : vector<14x128xf32>
    %71 = tpu.matmul %69, %70, %cst_50 {dimension_numbers = #tpu.dot_dimension_numbers<[1], [0], [0], [1], [0, 0, 1, 1], [], []>} : vector<14x384xbf16>, vector<384x128xbf16>, vector<14x128xf32> -> vector<14x128xf32>
    %c0_51 = arith.constant 0 : index
    %c0_52 = arith.constant 0 : index
    %72 = vector.load %arg7[%c0_51, %c0_52] : memref<1x128xf32, #tpu.memory_space<vmem>>, vector<1x128xf32>
    %73 = vector.broadcast %72 : vector<1x128xf32> to vector<14x128xf32>
    %74 = arith.addf %71, %73 : vector<14x128xf32>
    %cst_53 = arith.constant 5.000000e-01 : f32
    %75 = vector.broadcast %cst_53 : f32 to vector<14x128xf32>
    %76 = arith.mulf %75, %74 : vector<14x128xf32>
    %77 = arith.mulf %74, %74 : vector<14x128xf32>
    %78 = arith.mulf %77, %74 : vector<14x128xf32>
    %cst_54 = arith.constant 4.471500e-02 : f32
    %79 = vector.broadcast %cst_54 : f32 to vector<14x128xf32>
    %80 = arith.mulf %79, %78 : vector<14x128xf32>
    %81 = arith.addf %74, %80 : vector<14x128xf32>
    %cst_55 = arith.constant 0.797884583 : f32
    %82 = vector.broadcast %cst_55 : f32 to vector<14x128xf32>
    %83 = arith.mulf %82, %81 : vector<14x128xf32>
    %84 = math.tanh %83 : vector<14x128xf32>
    %cst_56 = arith.constant 1.000000e+00 : f32
    %85 = vector.broadcast %cst_56 : f32 to vector<14x128xf32>
    %86 = arith.addf %85, %84 : vector<14x128xf32>
    %87 = arith.mulf %76, %86 : vector<14x128xf32>
    %c0_57 = arith.constant 0 : index
    %c0_58 = arith.constant 0 : index
    %88 = vector.load %arg13[%c0_57, %c0_58] : memref<14x128xf32, #tpu.memory_space<vmem>>, vector<14x128xf32>
    tpu.vector_store %arg13[%c0_57, %c0_58], %87 {strides = array<i32>} : memref<14x128xf32, #tpu.memory_space<vmem>>, vector<14x128xf32>,
    %c0_59 = arith.constant 0 : index
    %c0_60 = arith.constant 0 : index
    %89 = tpu.strided_load %arg13[%c0_59, %c0_60] {strides = array<i32: 2, 1>} : memref<14x128xf32, #tpu.memory_space<vmem>>, vector<6x128xf32>
    %90 = arith.truncf %89 : vector<6x128xf32> to vector<6x128xbf16>
    %c1_61 = arith.constant 1 : index
    %c0_62 = arith.constant 0 : index
    %91 = tpu.strided_load %arg13[%c1_61, %c0_62] {strides = array<i32: 2, 1>} : memref<14x128xf32, #tpu.memory_space<vmem>>, vector<6x128xf32>
    %92 = arith.truncf %91 : vector<6x128xf32> to vector<6x128xbf16>
    %c2_63 = arith.constant 2 : index
    %c0_64 = arith.constant 0 : index
    %93 = tpu.strided_load %arg13[%c2_63, %c0_64] {strides = array<i32: 2, 1>} : memref<14x128xf32, #tpu.memory_space<vmem>>, vector<6x128xf32>
    %94 = arith.truncf %93 : vector<6x128xf32> to vector<6x128xbf16>
    %95 = tpu.concatenate %90, %92, %94 in 1 : vector<6x128xbf16>, vector<6x128xbf16>, vector<6x128xbf16> -> vector<6x384xbf16>
    %c0_65 = arith.constant 0 : index
    %c0_66 = arith.constant 0 : index
    %96 = vector.load %arg8[%c0_65, %c0_66] : memref<384x128xbf16, #tpu.memory_space<vmem>>, vector<384x128xbf16>
    %cst_67 = arith.constant dense<0.000000e+00> : vector<6x128xf32>
    %97 = tpu.matmul %95, %96, %cst_67 {dimension_numbers = #tpu.dot_dimension_numbers<[1], [0], [0], [1], [0, 0, 1, 1], [], []>} : vector<6x384xbf16>, vector<384x128xbf16>, vector<6x128xf32> -> vector<6x128xf32>
    %c0_68 = arith.constant 0 : index
    %c0_69 = arith.constant 0 : index
    %98 = vector.load %arg9[%c0_68, %c0_69] : memref<1x128xf32, #tpu.memory_space<vmem>>, vector<1x128xf32>
    %99 = vector.broadcast %98 : vector<1x128xf32> to vector<6x128xf32>
    %100 = arith.addf %97, %99 : vector<6x128xf32>
    %cst_70 = arith.constant 5.000000e-01 : f32
    %101 = vector.broadcast %cst_70 : f32 to vector<6x128xf32>
    %102 = arith.mulf %101, %100 : vector<6x128xf32>
    %103 = arith.mulf %100, %100 : vector<6x128xf32>
    %104 = arith.mulf %103, %100 : vector<6x128xf32>
    %cst_71 = arith.constant 4.471500e-02 : f32
    %105 = vector.broadcast %cst_71 : f32 to vector<6x128xf32>
    %106 = arith.mulf %105, %104 : vector<6x128xf32>
    %107 = arith.addf %100, %106 : vector<6x128xf32>
    %cst_72 = arith.constant 0.797884583 : f32
    %108 = vector.broadcast %cst_72 : f32 to vector<6x128xf32>
    %109 = arith.mulf %108, %107 : vector<6x128xf32>
    %110 = math.tanh %109 : vector<6x128xf32>
    %cst_73 = arith.constant 1.000000e+00 : f32
    %111 = vector.broadcast %cst_73 : f32 to vector<6x128xf32>
    %112 = arith.addf %111, %110 : vector<6x128xf32>
    %113 = arith.mulf %102, %112 : vector<6x128xf32>
    %c0_74 = arith.constant 0 : index
    %c0_75 = arith.constant 0 : index
    %c0_76 = arith.constant 0 : index
    %114 = vector.load %arg10[%c0_74, %c0_75, %c0_76] : memref<1x6x128xf32, #tpu.memory_space<vmem>>, vector<1x6x128xf32>
    %115 = vector.shape_cast %114 : vector<1x6x128xf32> to vector<6x128xf32>
    %116 = vector.shape_cast %113 : vector<6x128xf32> to vector<1x6x128xf32>
    tpu.vector_store %arg10[%c0_74, %c0_75, %c0_76], %116 {strides = array<i32>} : memref<1x6x128xf32, #tpu.memory_space<vmem>>, vector<1x6x128xf32>,
    return
  }
  func.func @transform_0(%arg0: i32) -> (i32, i32, i32) {
    %c0_i32 = arith.constant 0 : i32
    %c0_i32_0 = arith.constant 0 : i32
    %c0_i32_1 = arith.constant 0 : i32
    return %arg0, %c0_i32, %c0_i32_0 : i32, i32, i32
  }
  func.func @transform_1(%arg0: i32) -> (i32, i32, i32) {
    %c0_i32 = arith.constant 0 : i32
    %c0_i32_0 = arith.constant 0 : i32
    %c0_i32_1 = arith.constant 0 : i32
    %c0_i32_2 = arith.constant 0 : i32
    return %c0_i32, %c0_i32_0, %c0_i32_1 : i32, i32, i32
  }
  func.func @transform_2(%arg0: i32) -> (i32, i32) {
    %c0_i32 = arith.constant 0 : i32
    %c0_i32_0 = arith.constant 0 : i32
    %c0_i32_1 = arith.constant 0 : i32
    return %c0_i32, %c0_i32_0 : i32, i32
  }
  func.func @transform_3(%arg0: i32) -> (i32, i32) {
    %c0_i32 = arith.constant 0 : i32
    %c0_i32_0 = arith.constant 0 : i32
    %c0_i32_1 = arith.constant 0 : i32
    return %c0_i32, %c0_i32_0 : i32, i32
  }
  func.func @transform_4(%arg0: i32) -> (i32, i32) {
    %c0_i32 = arith.constant 0 : i32
    %c0_i32_0 = arith.constant 0 : i32
    %c0_i32_1 = arith.constant 0 : i32
    return %c0_i32, %c0_i32_0 : i32, i32
  }
  func.func @transform_5(%arg0: i32) -> (i32, i32) {
    %c0_i32 = arith.constant 0 : i32
    %c0_i32_0 = arith.constant 0 : i32
    %c0_i32_1 = arith.constant 0 : i32
    return %c0_i32, %c0_i32_0 : i32, i32
  }
  func.func @transform_6(%arg0: i32) -> (i32, i32) {
    %c0_i32 = arith.constant 0 : i32
    %c0_i32_0 = arith.constant 0 : i32
    %c0_i32_1 = arith.constant 0 : i32
    return %c0_i32, %c0_i32_0 : i32, i32
  }
  func.func @transform_7(%arg0: i32) -> (i32, i32) {
    %c0_i32 = arith.constant 0 : i32
    %c0_i32_0 = arith.constant 0 : i32
    %c0_i32_1 = arith.constant 0 : i32
    return %c0_i32, %c0_i32_0 : i32, i32
  }
  func.func @transform_8(%arg0: i32) -> (i32, i32) {
    %c0_i32 = arith.constant 0 : i32
    %c0_i32_0 = arith.constant 0 : i32
    %c0_i32_1 = arith.constant 0 : i32
    return %c0_i32, %c0_i32_0 : i32, i32
  }
  func.func @transform_9(%arg0: i32) -> (i32, i32, i32) {
    %c0_i32 = arith.constant 0 : i32
    %c0_i32_0 = arith.constant 0 : i32
    %c0_i32_1 = arith.constant 0 : i32
    return %arg0, %c0_i32, %c0_i32_0 : i32, i32, i32
  }
}

</mosaic_0001>

<bundles_post_ra>
// kernel: aslp_conv1d_subsampling8.1
= control target key start
LH: loop header
LB: loop body
LE: loop exit
PB: predicated region body
PF: predicated region fallthrough
CT: control target
= control target key end

     0   :  { %s2434_s30 = smov 0   ;;  %s2818_s0 = inlined_call_operand.vmem [shape: f32[2,64,80], index: 0, kind: input, shape index: {}]   ;;  %s2819_s1 = inlined_call_operand.vmem [shape: bf16[3,80,128], index: 1, kind: input, shape index: {}]   ;;  %s2820_s2 = inlined_call_operand.vmem [shape: f32[1,128], index: 2, kind: input, shape index: {}]   ;;  %s2821_s3 = inlined_call_operand.vmem [shape: bf16[384,128], index: 3, kind: input, shape index: {}]   ;;  %s2822_s4 = inlined_call_operand.vmem [shape: f32[1,128], index: 4, kind: input, shape index: {}]   ;;  %s2823_s5 = inlined_call_operand.vmem [shape: bf16[384,128], index: 5, kind: input, shape index: {}]   ;;  %s2824_s6 = inlined_call_operand.vmem [shape: f32[1,128], index: 6, kind: input, shape index: {}]   ;;  %s2825_s7 = inlined_call_operand.vmem [shape: bf16[384,128], index: 7, kind: input, shape index: {}]   ;;  %s2826_s8 = inlined_call_operand.vmem [shape: f32[1,128], index: 8, kind: input, shape index: {}]   ;;  %s2827_s9 = inlined_call_operand.vmem [shape: f32[2,6,128], index: 9, kind: output, shape index: {}]  }
   0x1 LB: > { %s1856_s10 = sadd.s32 4294967295, %s2380_s30   ;;  %p1860_p0 = scmp.ge.s32.totalorder %s2380_s30, 1  ;;  %s2380_s30 = sphi %s2434_s30, %s19_s30  }
   0x2   : > { %p287_p1 = scmp.lt.s32.totalorder %s2380_s30, 3 }
   0x4   : > { %p288_p2 = pnand %p1860_p0, %p287_p1 }
   0x5   : > { %v2257_v0 = vld [vmem:[%s2819_s1 + $0x28] sm:$0xff] (!%p288_p2)   ;;  %p322_p3 = scmp.lt.s32.totalorder (!%p288_p2), %s1856_s10, 1  ;;  %v2258_v1 = vld [vmem:[%s2819_s1 + $0x30] sm:$0xff] (!%p288_p2)   ;;  %v2259_v2 = vld [vmem:[%s2819_s1 + $0x38] sm:$0xff] (!%p288_p2)   ;;  %vm407_vm0 = vcmask (!%p288_p2), 654336   ;;  %vm2383_vm1 = vmmov (!%p288_p2), 0  }
   0x6   : > { %291 = sbr.rel (%p288_p2) target bundleno = 1106 (0x452), region = 56  ;;  %2117 = vmatprep.subr.bf16.mxu0 (!%p288_p2), %v2257_v0  ;;  %v2260_v6 = vld [vmem:[%s2819_s1 + $0x40] sm:$0xff] (!%p288_p2)   ;;  %v2261_v7 = vld [vmem:[%s2819_s1 + $0x48] sm:$0xff] (!%p288_p2)   ;;  %v2264_v17 = vld [vmem:[%s2819_s1 + $0x10] sm:$0xff] (!%p288_p2)  }
   0x7   : > { %2118 = vmatpush3.bf16.msra.mxu0 (!%p288_p2), %v2257_v0  ;;  %v2262_v8 = vld [vmem:[%s2819_s1] sm:$0xff] (!%p288_p2)   ;;  %v2263_v15 = vld [vmem:[%s2819_s1 + $0x8] sm:$0xff] (!%p288_p2)   ;;  %v2265_v21 = vld [vmem:[%s2819_s1 + $0x18] sm:$0xff] (!%p288_p2)  }
   0x8   : > { %2119 = vmatprep.subr.bf16.mxu0 (!%p288_p2), %v2258_v1  ;;  %v2266_v24 = vld [vmem:[%s2819_s1 + $0x20] sm:$0xff] (!%p288_p2)   ;;  %v2267_v27 = vld [vmem:[%s2819_s1 + $0x50] sm:$0xff] (!%p288_p2)   ;;  %v2268_v31 = vld [vmem:[%s2819_s1 + $0x58] sm:$0xff] (!%p288_p2)  }
   0x9   : > { %v2269_v35 = vld [vmem:[%s2819_s1 + $0x60] sm:$0xff] (!%p288_p2)   ;;  %v2270_v39 = vld [vmem:[%s2819_s1 + $0x68] sm:$0xff] (!%p288_p2)   ;;  %v2271_v41 = vld [vmem:[%s2819_s1 + $0x70] sm:$0xff] (!%p288_p2)  }
   0xa   : > { %v2272_v51 = vld [vmem:[%s2821_s3 + $0x40] sm:$0xff] (!%p288_p2)   ;;  %v2274_v53 = vld [vmem:[%s2821_s3 + $0x48] sm:$0xff] (!%p288_p2)   ;;  %v2276_v55 = vld [vmem:[%s2821_s3 + $0x50] sm:$0xff] (!%p288_p2)  }
   0xb   : > { %2120 = vmatpush3.bf16.msra.mxu0 (!%p288_p2), %v2258_v1  ;;  %2017 = vmatprep.subr.bf16.mxu1 (!%p288_p2), %v2272_v51  ;;  %v2273_v52 = vld [vmem:[%s2821_s3] sm:$0xff] (!%p288_p2)   ;;  %v2275_v54 = vld [vmem:[%s2821_s3 + $0x8] sm:$0xff] (!%p288_p2)   ;;  %v2277_v56 = vld [vmem:[%s2821_s3 + $0x10] sm:$0xff] (!%p288_p2)  }
   0xc   : > { %2121 = vmatprep.subr.bf16.mxu0 (!%p288_p2), %v2259_v2  ;;  %2018 = vmatpush3.bf16.msra.mxu1 (!%p288_p2), %v2273_v52  ;;  %v2278_v57 = vld [vmem:[%s2821_s3 + $0x58] sm:$0xff] (!%p288_p2)   ;;  %v2280_v59 = vld [vmem:[%s2821_s3 + $0x60] sm:$0xff] (!%p288_p2)   ;;  %v2282_v61 = vld [vmem:[%s2821_s3 + $0x68] sm:$0xff] (!%p288_p2)  }
   0xd   : > { %s2829_s10 = smov (!%p322_p3, %s1856_s10), 1  ;;  %2019 = vmatprep.subr.bf16.mxu1 %v2274_v53  ;;  %v2279_v58 = vld [vmem:[%s2821_s3 + $0x18] sm:$0xff]   ;;  %v2281_v60 = vld [vmem:[%s2821_s3 + $0x20] sm:$0xff]   ;;  %v2283_v62 = vld [vmem:[%s2821_s3 + $0x28] sm:$0xff]  }
   0xe   : > { %s1989_s17 = sshll.u32 %s2829_s10, 6  ;;  %v2284_v63 = vld [vmem:[%s2821_s3 + $0x70] sm:$0xff]   ;;  %v2286_v1 = vld [vmem:[%s2821_s3 + $0x78] sm:$0xff]   ;;  %s1863_s27 = sshll.u32 %s2829_s10, 3 }
   0xf   : > { %s2457_s20 = scalar_lea.vmem %s2818_s0, %s1989_s17  ;;  %2122 = vmatpush3.bf16.msra.mxu0 %v2259_v2  ;;  %v2285_v0 = vld [vmem:[%s2821_s3 + $0x30] sm:$0xff]   ;;  %v2287_v2 = vld [vmem:[%s2821_s3 + $0x38] sm:$0xff]   ;;  %s330_s11 = scalar_lea.vmem %s2827_s9, %s1863_s27 }
  0x10   : > { %v354_v3 = vld [vmem:[%s2457_s20 + $0x1] sm:$0xff]  ;;  %v355_v4 = vld [vmem:[%s2457_s20 + $0x9] sm:$0xff]  ;;  %2123 = vmatprep.subr.bf16.mxu0 %v2260_v6  ;;  %v356_v9 = vld [vmem:[%s2457_s20 + $0x11] sm:$0xff]  ;;  %2020 = vmatpush3.bf16.msra.mxu1 %v2275_v54 }
  0x11   : > { %v362_v5 = vpack.c.bf16 %v355_v4, %v354_v3  ;;  %v357_v10 = vld [vmem:[%s2457_s20 + $0x19] sm:$0xff]  ;;  %v358_v11 = vld [vmem:[%s2457_s20 + $0x21] sm:$0xff]  ;;  %v359_v12 = vld [vmem:[%s2457_s20 + $0x29] sm:$0xff]  ;;  %2021 = vmatprep.subr.bf16.mxu1 %v2276_v55 }
  0x12   : > { %v363_v13 = vpack.c.bf16 %v357_v10, %v356_v9  ;;  %v364_v14 = vpack.c.bf16 %v359_v12, %v358_v11  ;;  %v360_v16 = vld [vmem:[%s2457_s20 + $0x31] sm:$0xff]  ;;  %v361_v18 = vld [vmem:[%s2457_s20 + $0x39] sm:$0x3f]  ;;  %v332_v19 = vld [vmem:[%s2457_s20] sm:$0xff] }
  0x13   : > { %2127 = vmatprep.mubr.msk.bf16.mxu0 %vm407_vm0, %v362_v5  ;;  %2124 = vmatpush3.bf16.msra.mxu0 %v2260_v6  ;;  %v333_v20 = vld [vmem:[%s2457_s20 + $0x8] sm:$0xff]  ;;  %v365_v22 = vpack.c.bf16 %v361_v18, %v360_v16  ;;  %v334_v25 = vld [vmem:[%s2457_s20 + $0x10] sm:$0xff]  ;;  %v335_v26 = vld [vmem:[%s2457_s20 + $0x18] sm:$0xff] }
  0x14   : > { %2125 = vmatprep.subr.bf16.mxu0 %v2261_v7  ;;  %v340_v23 = vpack.c.bf16 %v333_v20, %v332_v19  ;;  %v336_v28 = vld [vmem:[%s2457_s20 + $0x20] sm:$0xff]  ;;  %v337_v29 = vld [vmem:[%s2457_s20 + $0x28] sm:$0xff]  ;;  %v341_v30 = vpack.c.bf16 %v335_v26, %v334_v25  ;;  %v338_v33 = vld [vmem:[%s2457_s20 + $0x30] sm:$0xff]  ;;  %2022 = vmatpush3.bf16.msra.mxu1 %v2277_v56 }
  0x15   : > { %v342_v32 = vpack.c.bf16 %v337_v29, %v336_v28  ;;  %v339_v34 = vld [vmem:[%s2457_s20 + $0x38] sm:$0x3f]  ;;  %v592_v36 = vld [vmem:[%s2457_s20 + $0x2] sm:$0xff]  ;;  %v593_v37 = vld [vmem:[%s2457_s20 + $0xa] sm:$0xff]  ;;  %2023 = vmatprep.subr.bf16.mxu1 %v2278_v57 }
  0x16   : > { %v343_v38 = vpack.c.bf16 %v339_v34, %v338_v33  ;;  %v600_v40 = vpack.c.bf16 %v593_v37, %v592_v36  ;;  %v594_v42 = vld [vmem:[%s2457_s20 + $0x12] sm:$0xff]  ;;  %v595_v43 = vld [vmem:[%s2457_s20 + $0x1a] sm:$0xff]  ;;  %v596_v44 = vld [vmem:[%s2457_s20 + $0x22] sm:$0xff] }
  0x17   : > { %2126 = vmatpush3.bf16.msra.mxu0 %v2261_v7  ;;  %v597_v45 = vld [vmem:[%s2457_s20 + $0x2a] sm:$0xff]  ;;  %v601_v46 = vpack.c.bf16 %v595_v43, %v594_v42  ;;  %v598_v48 = vld [vmem:[%s2457_s20 + $0x32] sm:$0xff]  ;;  %v599_v49 = vld [vmem:[%s2457_s20 + $0x3a] sm:$0x3f] }
  0x18   : > { %2135 = vmatprep.subr.bf16.mxu0 %v2262_v8  ;;  %v602_v47 = vpack.c.bf16 %v597_v45, %v596_v44  ;;  %v603_v50 = vpack.c.bf16 %v599_v49, %v598_v48  ;;  %2024 = vmatpush3.bf16.msra.mxu1 %v2279_v58  ;;  %v2582_v3 = vld [vmem:[%s2821_s3 + $0x80] sm:$0xff]  }
  0x19   : > { %2025 = vmatprep.subr.bf16.mxu1 %v2280_v59  ;;  %v1911_v4 = vld [vmem:[%s2820_s2] ss:$0 sm:$0xff] }
  0x1a   : > { %2128 = vmatmul.mubr.msk.bf16.vlgmr.msra.gmra.mrb[0].mxu0 %vm407_vm0, %v363_v13 }
  0x1b   : > { %2136 = vmatpush3.bf16.msra.mxu0 %v2262_v8  ;;  %2131 = vmatprep.mubr.msk.bf16.mxu0 %vm407_vm0, %v364_v14 }
  0x1c   : > { %2137 = vmatprep.subr.bf16.mxu0 %v2263_v15  ;;  %2026 = vmatpush3.bf16.msra.mxu1 %v2281_v60 }
  0x1d   : > { %2027 = vmatprep.subr.bf16.mxu1 %v2282_v61 }
  0x1f   : > { %2138 = vmatpush3.bf16.msra.mxu0 %v2263_v15 }
  0x20   : > { %2139 = vmatprep.subr.bf16.mxu0 %v2264_v17  ;;  %2028 = vmatpush3.bf16.msra.mxu1 %v2283_v62 }
  0x21   : > { %2029 = vmatprep.subr.bf16.mxu1 %v2284_v63 }
  0x22   : > { %2132 = vmatmul.mubr.msk.bf16.gmra.mrb[4].mxu0 %vm407_vm0, %v365_v22 }
  0x23   : > { %2140 = vmatpush3.bf16.msra.mxu0 %v2264_v17  ;;  %2145 = vmatprep.mubr.msk.bf16.mxu0 %vm407_vm0, %v340_v23 }
  0x24   : > { %2141 = vmatprep.subr.bf16.mxu0 %v2265_v21  ;;  %2030 = vmatpush3.bf16.msra.mxu1 %v2285_v0 }
  0x25   : > { %2031 = vmatprep.subr.bf16.mxu1 %v2286_v1 }
  0x27   : > { %2142 = vmatpush3.bf16.msra.mxu0 %v2265_v21 }
  0x28   : > { %2143 = vmatprep.subr.bf16.mxu0 %v2266_v24  ;;  %2032 = vmatpush3.bf16.msra.mxu1 %v2287_v2 }
  0x29   : > { %2171 = vmatprep.subr.bf16.mxu1 %v2582_v3 }
  0x2b   : > { %2144 = vmatpush3.bf16.msra.mxu0 %v2266_v24 }
  0x2c   : > { %2153 = vmatprep.subr.bf16.mxu0 %v2267_v27 }
  0x2e   : > { %2146 = vmatmul.mubr.msk.bf16.vlgmr.msra.gmra.mrb[0].mxu0 %vm407_vm0, %v341_v30 }
  0x2f   : > { %2154 = vmatpush3.bf16.msra.mxu0 %v2267_v27  ;;  %2149 = vmatprep.mubr.msk.bf16.mxu0 %vm407_vm0, %v342_v32 }
  0x30   : > { %2155 = vmatprep.subr.bf16.mxu0 %v2268_v31 }
  0x33   : > { %2156 = vmatpush3.bf16.msra.mxu0 %v2268_v31 }
  0x34   : > { %2157 = vmatprep.subr.bf16.mxu0 %v2269_v35 }
  0x36   : > { %2150 = vmatmul.mubr.msk.bf16.gmra.mrb[4].mxu0 %vm407_vm0, %v343_v38 }
  0x37   : > { %2158 = vmatpush3.bf16.msra.mxu0 %v2269_v35  ;;  %2163 = vmatprep.mubr.msk.bf16.mxu0 %vm407_vm0, %v600_v40 }
  0x38   : > { %2159 = vmatprep.subr.bf16.mxu0 %v2270_v39 }
  0x3b   : > { %2160 = vmatpush3.bf16.msra.mxu0 %v2270_v39 }
  0x3c   : > { %2161 = vmatprep.subr.bf16.mxu0 %v2271_v41 }
  0x3f   : > { %2162 = vmatpush3.bf16.msra.mxu0 %v2271_v41 }
  0x42   : > { %2164 = vmatmul.mubr.msk.bf16.vlgmr.msra.gmra.mrb[0].mxu0 %vm407_vm0, %v601_v46 }
  0x43   : > { %2167 = vmatprep.mubr.msk.bf16.mxu0 %vm407_vm0, %v602_v47 }
  0x4a   : > { %2168 = vmatmul.mubr.msk.bf16.gmra.mrb[4].mxu0 %vm407_vm0, %v603_v50 }
 0x115   : > { %v2165_v5 = vpop.f32.mrb[0].mxu0 }
 0x116   : > { %v739_v6 = vadd.f32 %v2165_v5, %v1911_v4  ;;  %v691_v7 = vpop.f32.mrb[1].mxu0 }
 0x117   : > { %v2588_v8 = vadd.f32 %v1911_v4, %v691_v7  ;;  %v2166_v9 = vpop.f32.mrb[2].mxu0 }
 0x118   : > { %v755_v10 = vmul.f32 %v739_v6, %v739_v6  ;;  %v2590_v11 = vadd.f32 %v2166_v9, %v1911_v4  ;;  %v694_v12 = vpop.f32.mrb[3].mxu0  ;;  %v747_v62 = vmul.f32 0.5, %v739_v6 }
 0x119   : > { %v753_v13 = vmul.f32 %v2588_v8, %v2588_v8  ;;  %v2594_v14 = vadd.f32 %v1911_v4, %v694_v12  ;;  %v745_v2 = vmul.f32 0.5, %v2588_v8 }
 0x11a   : > { %v763_v15 = vmul.f32 %v755_v10, %v739_v6  ;;  %v756_v16 = vmul.f32 %v2590_v11, %v2590_v11  ;;  %v748_v9 = vmul.f32 0.5, %v2590_v11 }
 0x11b   : > { %v761_v17 = vmul.f32 %v753_v13, %v2588_v8  ;;  %v754_v18 = vmul.f32 %v2594_v14, %v2594_v14  ;;  %v746_v13 = vmul.f32 0.5, %v2594_v14 }
 0x11c   : > { %v771_v19 = vmul.f32 0.044715, %v763_v15  ;;  %v764_v20 = vmul.f32 %v756_v16, %v2590_v11 }
 0x11d   : > { %v769_v21 = vmul.f32 0.044715, %v761_v17  ;;  %v762_v22 = vmul.f32 %v754_v18, %v2594_v14  ;;  %v2169_v23 = vpop.f32.mrb[4].mxu0 }
 0x11e   : > { %v779_v24 = vadd.f32 %v771_v19, %v739_v6  ;;  %v772_v25 = vmul.f32 0.044715, %v764_v20  ;;  %v2603_v26 = vadd.f32 %v2169_v23, %v1911_v4  ;;  %v707_v27 = vpop.f32.mrb[5].mxu0 }
 0x11f   : > { %v777_v28 = vadd.f32 %v769_v21, %v2588_v8  ;;  %v770_v29 = vmul.f32 0.044715, %v762_v22  ;;  %v741_v30 = vadd.f32 %v1911_v4, %v707_v27  ;;  %v2170_v31 = vpop.f32.mrb[6].mxu0 }
 0x120   : > { %v787_v32 = vmul.f32 0.7978846, %v779_v24  ;;  %v780_v33 = vadd.f32 %v772_v25, %v2590_v11  ;;  %v759_v34 = vmul.f32 %v2603_v26, %v2603_v26  ;;  %v710_v35 = vpop.f32.mrb[7].mxu0  ;;  %v744_v41 = vadd.f32 %v2170_v31, %v1911_v4 }
 0x121   : > { %v785_v36 = vmul.f32 0.7978846, %v777_v28  ;;  %v778_v37 = vadd.f32 %v770_v29, %v2594_v14  ;;  %v757_v38 = vmul.f32 %v741_v30, %v741_v30  ;;  %v742_v44 = vadd.f32 %v1911_v4, %v710_v35 }
 0x122   : > { %2344 = vtanh.f32 %v787_v32  ;;  %v788_v39 = vmul.f32 0.7978846, %v780_v33  ;;  %v767_v40 = vmul.f32 %v759_v34, %v2603_v26  ;;  %v760_v46 = vmul.f32 %v744_v41, %v744_v41 }
 0x123   : > { %2346 = vtanh.f32 %v785_v36  ;;  %v786_v42 = vmul.f32 0.7978846, %v778_v37  ;;  %v765_v43 = vmul.f32 %v757_v38, %v741_v30  ;;  %v758_v48 = vmul.f32 %v742_v44, %v742_v44  ;;  %v2290_v37 = vld [vmem:[%s2821_s3 + $0x90] sm:$0xff]   ;;  %v2291_v38 = vld [vmem:[%s2821_s3 + $0x98] sm:$0xff]  }
 0x124   : > { %2348 = vtanh.f32 %v788_v39  ;;  %v775_v45 = vmul.f32 0.044715, %v767_v40  ;;  %v768_v50 = vmul.f32 %v760_v46, %v744_v41  ;;  %v751_v18 = vmul.f32 0.5, %v2603_v26 }
 0x125   : > { %2350 = vtanh.f32 %v786_v42  ;;  %v773_v47 = vmul.f32 0.044715, %v765_v43  ;;  %v766_v52 = vmul.f32 %v758_v48, %v742_v44  ;;  %v749_v20 = vmul.f32 0.5, %v741_v30  ;;  %v2293_v48 = vld [vmem:[%s2821_s3 + $0xa8] sm:$0xff]  }
 0x126   : > { %v783_v49 = vadd.f32 %v775_v45, %v2603_v26  ;;  %v776_v54 = vmul.f32 0.044715, %v768_v50  ;;  %v752_v14 = vmul.f32 0.5, %v744_v41  ;;  %v750_v27 = vmul.f32 0.5, %v742_v44  ;;  %v2295_v50 = vld [vmem:[%s2821_s3 + $0xb8] sm:$0xff]  }
 0x127   : > { %v781_v51 = vadd.f32 %v773_v47, %v741_v30  ;;  %v774_v56 = vmul.f32 0.044715, %v766_v52  ;;  %v2289_v30 = vld [vmem:[%s2821_s3 + $0x88] sm:$0xff]   ;;  %v2292_v47 = vld [vmem:[%s2821_s3 + $0xa0] sm:$0xff]  }
 0x128   : > { %v791_v53 = vmul.f32 0.7978846, %v783_v49  ;;  %v784_v57 = vadd.f32 %v776_v54, %v744_v41  ;;  %v2294_v49 = vld [vmem:[%s2821_s3 + $0xb0] sm:$0xff]   ;;  %v2296_v54 = vld [vmem:[%s2823_s5 + $0x40] sm:$0xff]  }
 0x129   : > { %v789_v55 = vmul.f32 0.7978846, %v781_v51  ;;  %v782_v58 = vadd.f32 %v774_v56, %v742_v44  ;;  %v2382_v56 = vmov 0.0   ;;  %2055 = vmatprep.subr.bf16.mxu0 %v2296_v54 }
 0x12a   : > { %2352 = vtanh.f32 %v791_v53  ;;  %v792_v60 = vmul.f32 0.7978846, %v784_v57  ;;  %v2298_v57 = vld [vmem:[%s2823_s5] sm:$0xff]  }
 0x12b   : > { %2354 = vtanh.f32 %v789_v55  ;;  %v790_v0 = vmul.f32 0.7978846, %v782_v58  ;;  %v2297_v55 = vld [vmem:[%s2823_s5 + $0x80] sm:$0xff]   ;;  %2056 = vmatpush3.bf16.msra.mxu0 %v2298_v57  ;;  %v2299_v58 = vld [vmem:[%s2823_s5 + $0x48] sm:$0xff]  }
 0x12c   : > { %v2345_v59 = vpop.eup %2344  ;;  %2356 = vtanh.f32 %v792_v60  ;;  %v2301_v60 = vld [vmem:[%s2823_s5 + $0x8] sm:$0xff]   ;;  %2057 = vmatprep.subr.bf16.mxu0 %v2299_v58 }
 0x12d   : > { %v2347_v61 = vpop.eup %2346  ;;  %v803_v63 = vadd.f32 1.0, %v2345_v59  ;;  %2358 = vtanh.f32 %v790_v0  ;;  %v2300_v59 = vld [vmem:[%s2823_s5 + $0x88] sm:$0xff]   ;;  %v2305_v0 = vld [vmem:[%s2823_s5 + $0x58] sm:$0xff]  }
 0x12e   : > { %v2349_v1 = vpop.eup %2348  ;;  %v801_v4 = vadd.f32 1.0, %v2347_v61  ;;  %v2302_v61 = vld [vmem:[%s2823_s5 + $0x50] sm:$0xff]  }
 0x12f   : > { %v2351_v5 = vpop.eup %2350  ;;  %v811_v7 = vmul.f32 %v803_v63, %v747_v62  ;;  %v804_v10 = vadd.f32 1.0, %v2349_v1  ;;  %2058 = vmatpush3.bf16.msra.mxu0 %v2301_v60  ;;  %v2303_v62 = vld [vmem:[%s2823_s5 + $0x90] sm:$0xff]   ;;  %v2306_v1 = vld [vmem:[%s2823_s5 + $0x98] sm:$0xff]  }
 0x130   : > { %v809_v12 = vmul.f32 %v801_v4, %v745_v2  ;;  %v802_v15 = vadd.f32 1.0, %v2351_v5  ;;  %v2304_v63 = vld [vmem:[%s2823_s5 + $0x10] sm:$0xff]   ;;  %2059 = vmatprep.subr.bf16.mxu0 %v2302_v61  ;;  %v2307_v2 = vld [vmem:[%s2823_s5 + $0x18] sm:$0xff]   ;;  %v2308_v4 = vld [vmem:[%s2823_s5 + $0x60] sm:$0xff]  }
 0x131   : > { %819 = vst [vmem:[#allocation2 + $0x10] sm:$0xff] %v811_v7  ;;  %v812_v16 = vmul.f32 %v804_v10, %v748_v9  ;;  %v2309_v5 = vld [vmem:[%s2823_s5 + $0xa0] sm:$0xff]   ;;  %v2311_v9 = vld [vmem:[%s2823_s5 + $0x68] sm:$0xff]  }
 0x132   : > { %817 = vst [vmem:[#allocation2] sm:$0xff] %v809_v12  ;;  %v810_v6 = vmul.f32 %v802_v15, %v746_v13  ;;  %v2310_v7 = vld [vmem:[%s2823_s5 + $0x20] sm:$0xff]   ;;  %v2312_v10 = vld [vmem:[%s2823_s5 + $0xa8] sm:$0xff]   ;;  %v2314_v13 = vld [vmem:[%s2823_s5 + $0x70] sm:$0xff]  }
 0x133   : > { %820 = vst [vmem:[#allocation2 + $0x18] sm:$0xff] %v812_v16  ;;  %2060 = vmatpush3.bf16.msra.mxu0 %v2304_v63  ;;  %v2313_v12 = vld [vmem:[%s2823_s5 + $0x28] sm:$0xff]   ;;  %v2315_v15 = vld [vmem:[%s2823_s5 + $0xb0] sm:$0xff]  }
 0x134   : > { %v2353_v17 = vpop.eup %2352  ;;  %818 = vst [vmem:[#allocation2 + $0x8] sm:$0xff] %v810_v6  ;;  %2061 = vmatprep.subr.bf16.mxu0 %v2305_v0  ;;  %v2316_v16 = vld [vmem:[%s2823_s5 + $0x30] sm:$0xff]   ;;  %v2317_v6 = vld [vmem:[%s2823_s5 + $0x78] sm:$0xff]  }
 0x135   : > { %v2355_v8 = vpop.eup %2354  ;;  %v807_v19 = vadd.f32 1.0, %v2353_v17  ;;  %v2318_v17 = vld [vmem:[%s2823_s5 + $0xb8] sm:$0xff]  }
 0x136   : > { %v805_v21 = vadd.f32 1.0, %v2355_v8  ;;  %v2357_v22 = vpop.eup %2356  ;;  %v2319_v8 = vld [vmem:[%s2823_s5 + $0x38] sm:$0xff]  }
 0x137   : > { %v815_v11 = vmul.f32 %v807_v19, %v751_v18  ;;  %v2359_v24 = vpop.eup %2358  ;;  %v808_v25 = vadd.f32 1.0, %v2357_v22  ;;  %2062 = vmatpush3.bf16.msra.mxu0 %v2307_v2 }
 0x138   : > { %v813_v23 = vmul.f32 %v805_v21, %v749_v20  ;;  %v806_v28 = vadd.f32 1.0, %v2359_v24  ;;  %2063 = vmatprep.subr.bf16.mxu0 %v2308_v4 }
 0x139   : > { %823 = vst [vmem:[#allocation2 + $0x30] sm:$0xff] %v815_v11  ;;  %v816_v32 = vmul.f32 %v808_v25, %v752_v14 }
 0x13a   : > { %821 = vst [vmem:[#allocation2 + $0x20] sm:$0xff] %v813_v23  ;;  %v837_v29 = vld [vmem:[#allocation2 + $0x11] ss:$2 sm:$0xff]  ;;  %v827_v31 = vld [vmem:[#allocation2 + $0x10] ss:$2 sm:$0xff]  ;;  %v814_v35 = vmul.f32 %v806_v28, %v750_v27 }
 0x13b   : > { %v835_v33 = vld [vmem:[#allocation2 + $0x1] ss:$2 sm:$0xff]  ;;  %v825_v34 = vld [vmem:[#allocation2] ss:$2 sm:$0xff]  ;;  %824 = vst [vmem:[#allocation2 + $0x38] sm:$0x3f] %v816_v32  ;;  %2064 = vmatpush3.bf16.msra.mxu0 %v2310_v7 }
 0x13c   : > { %v842_v26 = vpack.c.bf16 %v837_v29, %v835_v33  ;;  %v832_v36 = vpack.c.bf16 %v827_v31, %v825_v34  ;;  %822 = vst [vmem:[#allocation2 + $0x28] sm:$0xff] %v814_v35  ;;  %v845_v46 = vld [vmem:[#allocation2 + $0x2] ss:$2 sm:$0xff]  ;;  %2065 = vmatprep.subr.bf16.mxu0 %v2311_v9  ;;  %v1912_v29 = vld [vmem:[%s2822_s4] ss:$0 sm:$0xff] }
 0x13e   : > { %1085 = vmatprep.mubr.bf16.mxu1 %v842_v26 }
 0x13f   : > { %1086 = vmatmul.mubr.bf16.vlgmr.msra.gmra.mrb[0].mxu1 %v832_v36  ;;  %2066 = vmatpush3.bf16.msra.mxu0 %v2313_v12 }
 0x140   : > { %2172 = vmatpush3.bf16.msra.mxu1 %v2582_v3  ;;  %2067 = vmatprep.subr.bf16.mxu0 %v2314_v13 }
 0x141   : > { %2173 = vmatprep.subr.bf16.mxu1 %v2289_v30  ;;  %v847_v43 = vld [vmem:[#allocation2 + $0x12] ss:$2 sm:$0xff] }
 0x142   : > { %v841_v39 = vld [vmem:[#allocation2 + $0x31] ss:$2 sm:$0x3f]  ;;  %v831_v40 = vld [vmem:[#allocation2 + $0x30] ss:$2 sm:$0x3f]  ;;  %v852_v3 = vpack.c.bf16 %v847_v43, %v845_v46 }
 0x143   : > { %v839_v41 = vld [vmem:[#allocation2 + $0x21] ss:$2 sm:$0xff]  ;;  %v829_v42 = vld [vmem:[#allocation2 + $0x20] ss:$2 sm:$0xff]  ;;  %2068 = vmatpush3.bf16.msra.mxu0 %v2316_v16 }
 0x144   : > { %2174 = vmatpush3.bf16.msra.mxu1 %v2289_v30  ;;  %v843_v44 = vpack.c.bf16 %v841_v39, %v839_v41  ;;  %v833_v45 = vpack.c.bf16 %v831_v40, %v829_v42  ;;  %v849_v51 = vld [vmem:[#allocation2 + $0x22] ss:$2 sm:$0xff]  ;;  %v851_v52 = vld [vmem:[#allocation2 + $0x32] ss:$2 sm:$0x3f]  ;;  %2069 = vmatprep.subr.bf16.mxu0 %v2317_v6 }
 0x145   : > { %2175 = vmatprep.subr.bf16.mxu1 %v2290_v37  ;;  %v853_v53 = vpack.c.bf16 %v851_v52, %v849_v51 }
 0x146   : > { %1093 = vmatprep.mubr.bf16.mxu1 %v843_v44 }
 0x147   : > { %1094 = vmatmul.mubr.bf16.gmra.mrb[4].mxu1 %v833_v45  ;;  %2070 = vmatpush3.bf16.msra.mxu0 %v2319_v8 }
 0x148   : > { %2176 = vmatpush3.bf16.msra.mxu1 %v2290_v37  ;;  %2187 = vmatprep.mubr.bf16.mxu1 %v852_v3 }
 0x149   : > { %2177 = vmatprep.subr.bf16.mxu1 %v2291_v38 }
 0x14c   : > { %2178 = vmatpush3.bf16.msra.mxu1 %v2291_v38 }
 0x14d   : > { %2179 = vmatprep.subr.bf16.mxu1 %v2292_v47 }
 0x150   : > { %2180 = vmatpush3.bf16.msra.mxu1 %v2292_v47 }
 0x151   : > { %2181 = vmatprep.subr.bf16.mxu1 %v2293_v48 }
 0x154   : > { %2182 = vmatpush3.bf16.msra.mxu1 %v2293_v48 }
 0x155   : > { %2183 = vmatprep.subr.bf16.mxu1 %v2294_v49 }
 0x158   : > { %2184 = vmatpush3.bf16.msra.mxu1 %v2294_v49 }
 0x159   : > { %2185 = vmatprep.subr.bf16.mxu1 %v2295_v50 }
 0x15c   : > { %2186 = vmatpush3.bf16.msra.mxu1 %v2295_v50 }
 0x15d   : > { %2191 = vmatprep.subr.bf16.mxu1 %v2382_v56 }
 0x15f   : > { %2188 = vmatmul.mubr.bf16.vlgmr.msra.gmra.mrb[8].mxu1 %v853_v53 }
 0x160   : > { %2192 = vmatpush3.bf16.msra.mxu1 %v2297_v55  ;;  %2207 = vmatprep.mubr.msk.bf16.mxu1 %vm2383_vm1, %v2382_v56 }
 0x161   : > { %2193 = vmatprep.subr.bf16.mxu1 %v2382_v56 }
 0x164   : > { %2194 = vmatpush3.bf16.msra.mxu1 %v2300_v59 }
 0x165   : > { %2195 = vmatprep.subr.bf16.mxu1 %v2382_v56 }
 0x168   : > { %2196 = vmatpush3.bf16.msra.mxu1 %v2303_v62 }
 0x169   : > { %2197 = vmatprep.subr.bf16.mxu1 %v2382_v56 }
 0x16c   : > { %2198 = vmatpush3.bf16.msra.mxu1 %v2306_v1 }
 0x16d   : > { %2199 = vmatprep.subr.bf16.mxu1 %v2382_v56 }
 0x170   : > { %2200 = vmatpush3.bf16.msra.mxu1 %v2309_v5 }
 0x171   : > { %2201 = vmatprep.subr.bf16.mxu1 %v2382_v56 }
 0x174   : > { %2202 = vmatpush3.bf16.msra.mxu1 %v2312_v10 }
 0x175   : > { %2203 = vmatprep.subr.bf16.mxu1 %v2382_v56 }
 0x178   : > { %2204 = vmatpush3.bf16.msra.mxu1 %v2315_v15 }
 0x179   : > { %2205 = vmatprep.subr.bf16.mxu1 %v2382_v56 }
 0x17c   : > { %2206 = vmatpush3.bf16.msra.mxu1 %v2318_v17 }
 0x17d   : > { %2211 = vmatprep.subr.bf16.mxu1 %v2382_v56 }
 0x212   : > { %v2033_v18 = vpop.f32.mrb[0].mxu1 }
 0x213   : > { %v2034_v19 = vpop.f32.mrb[1].mxu1 }
 0x214   : > { %v2035_v20 = vadd.f32 %v2034_v19, %v2033_v18  ;;  %v2036_v21 = vpop.f32.mrb[2].mxu1 }
 0x215   : > { %v2037_v11 = vpop.f32.mrb[3].mxu1 }
 0x216   : > { %v2038_v22 = vadd.f32 %v2037_v11, %v2036_v21  ;;  %v1088_v33 = vadd.f32 %v2035_v20, %v1912_v29 }
 0x218   : > { %v1091_v37 = vadd.f32 %v2038_v22, %v1912_v29 }
 0x21a   : > { %v2039_v23 = vpop.f32.mrb[4].mxu1 }
 0x21b   : > { %v2040_v24 = vpop.f32.mrb[5].mxu1 }
 0x21c   : > { %v2041_v14 = vadd.f32 %v2040_v24, %v2039_v23  ;;  %v2042_v25 = vpop.f32.mrb[6].mxu1  ;;  %v2320_v24 = vld [vmem:[%s2825_s7 + $0x40] sm:$0xff]  }
 0x21d   : > { %v2043_v27 = vpop.f32.mrb[7].mxu1  ;;  %2086 = vmatprep.subr.bf16.mxu0 %v2320_v24 }
 0x21e   : > { %v2044_v28 = vadd.f32 %v2043_v27, %v2042_v25  ;;  %v1096_v31 = vadd.f32 %v2041_v14, %v1912_v29  ;;  %v2321_v14 = vld [vmem:[%s2825_s7 + $0x80] sm:$0xff]   ;;  %v2323_v27 = vld [vmem:[%s2825_s7 + $0x48] sm:$0xff]  }
 0x21f   : > { %v2322_v25 = vld [vmem:[%s2825_s7] sm:$0xff]  }
 0x220   : > { %v1099_v26 = vadd.f32 %v2044_v28, %v1912_v29  ;;  %v2324_v28 = vld [vmem:[%s2825_s7 + $0x88] sm:$0xff]  }
 0x221   : > { %v2325_v29 = vld [vmem:[%s2825_s7 + $0x8] sm:$0xff]  }
 0x232   : > { %v2189_v32 = vpop.f32.mrb[8].mxu1 }
 0x233   : > { %v1145_v34 = vadd.f32 %v2189_v32, %v1096_v31  ;;  %v1136_v35 = vpop.f32.mrb[9].mxu1  ;;  %v2326_v31 = vld [vmem:[%s2825_s7 + $0x50] sm:$0xff]  }
 0x234   : > { %v1137_v36 = vadd.f32 %v1136_v35, %v1088_v33  ;;  %v2190_v30 = vpop.f32.mrb[10].mxu1  ;;  %v2327_v32 = vld [vmem:[%s2825_s7 + $0x90] sm:$0xff]   ;;  %v2330_v35 = vld [vmem:[%s2825_s7 + $0x98] sm:$0xff]  }
 0x235   : > { %v1157_v38 = vmul.f32 %v1145_v34, %v1145_v34  ;;  %v1148_v39 = vadd.f32 %v2190_v30, %v1099_v26  ;;  %v1139_v40 = vpop.f32.mrb[11].mxu1  ;;  %v1153_v63 = vmul.f32 0.5, %v1145_v34  ;;  %v2328_v33 = vld [vmem:[%s2825_s7 + $0x10] sm:$0xff]   ;;  %v2331_v26 = vld [vmem:[%s2825_s7 + $0x18] sm:$0xff]   ;;  %v2333_v30 = vld [vmem:[%s2825_s7 + $0xa0] sm:$0xff]  }
 0x236   : > { %v1155_v41 = vmul.f32 %v1137_v36, %v1137_v36  ;;  %v1140_v42 = vadd.f32 %v1139_v40, %v1091_v37  ;;  %v1151_v2 = vmul.f32 0.5, %v1137_v36  ;;  %v2334_v37 = vld [vmem:[%s2825_s7 + $0x20] sm:$0xff]   ;;  %v2337_v40 = vld [vmem:[%s2825_s7 + $0x28] sm:$0xff]  }
 0x237   : > { %v1161_v43 = vmul.f32 %v1157_v38, %v1145_v34  ;;  %v1158_v44 = vmul.f32 %v1148_v39, %v1148_v39  ;;  %v1154_v9 = vmul.f32 0.5, %v1148_v39  ;;  %v2335_v38 = vld [vmem:[%s2825_s7 + $0x68] sm:$0xff]  }
 0x238   : > { %v1159_v45 = vmul.f32 %v1155_v41, %v1137_v36  ;;  %v1156_v46 = vmul.f32 %v1140_v42, %v1140_v42  ;;  %v1152_v13 = vmul.f32 0.5, %v1140_v42  ;;  %v2338_v41 = vld [vmem:[%s2825_s7 + $0x70] sm:$0xff]  }
 0x239   : > { %v1165_v3 = vmul.f32 0.044715, %v1161_v43  ;;  %v1162_v47 = vmul.f32 %v1158_v44, %v1148_v39  ;;  %v2340_v43 = vld [vmem:[%s2825_s7 + $0x30] sm:$0xff]   ;;  %v2341_v44 = vld [vmem:[%s2825_s7 + $0x78] sm:$0xff]  }
 0x23a   : > { %v1163_v48 = vmul.f32 0.044715, %v1159_v45  ;;  %v1160_v49 = vmul.f32 %v1156_v46, %v1140_v42  ;;  %v2342_v45 = vld [vmem:[%s2825_s7 + $0xb8] sm:$0xff]  }
 0x23b   : > { %v1169_v50 = vadd.f32 %v1165_v3, %v1145_v34  ;;  %v1166_v51 = vmul.f32 0.044715, %v1162_v47  ;;  %v2329_v34 = vld [vmem:[%s2825_s7 + $0x58] sm:$0xff]  }
 0x23c   : > { %v1167_v52 = vadd.f32 %v1163_v48, %v1137_v36  ;;  %v1164_v53 = vmul.f32 0.044715, %v1160_v49  ;;  %v2332_v36 = vld [vmem:[%s2825_s7 + $0x60] sm:$0xff]   ;;  %v2343_v46 = vld [vmem:[%s2825_s7 + $0x38] sm:$0xff]  }
 0x23d   : > { %v1173_v54 = vmul.f32 0.7978846, %v1169_v50  ;;  %v1170_v55 = vadd.f32 %v1166_v51, %v1148_v39  ;;  %v2336_v39 = vld [vmem:[%s2825_s7 + $0xa8] sm:$0xff]   ;;  %v1937_v49 = vld [vmem:[%s2824_s6] ss:$0 sm:$0xff] }
 0x23e   : > { %v1171_v57 = vmul.f32 0.7978846, %v1167_v52  ;;  %v1168_v58 = vadd.f32 %v1164_v53, %v1140_v42  ;;  %v2339_v42 = vld [vmem:[%s2825_s7 + $0xb0] sm:$0xff]  }
 0x23f   : > { %2360 = vtanh.f32 %v1173_v54  ;;  %v1174_v59 = vmul.f32 0.7978846, %v1170_v55 }
 0x240   : > { %2362 = vtanh.f32 %v1171_v57  ;;  %v1172_v60 = vmul.f32 0.7978846, %v1168_v58 }
 0x241   : > { %2364 = vtanh.f32 %v1174_v59 }
 0x242   : > { %2366 = vtanh.f32 %v1172_v60 }
 0x249   : > { %v2361_v61 = vpop.eup %2360 }
 0x24a   : > { %v2363_v62 = vpop.eup %2362  ;;  %v1181_v0 = vadd.f32 1.0, %v2361_v61 }
 0x24b   : > { %v2365_v1 = vpop.eup %2364  ;;  %v1179_v4 = vadd.f32 1.0, %v2363_v62 }
 0x24c   : > { %v2367_v5 = vpop.eup %2366  ;;  %v1185_v7 = vmul.f32 %v1181_v0, %v1153_v63  ;;  %v1182_v10 = vadd.f32 1.0, %v2365_v1 }
 0x24d   : > { %v1183_v12 = vmul.f32 %v1179_v4, %v1151_v2  ;;  %v1180_v15 = vadd.f32 1.0, %v2367_v5 }
 0x24e   : > { %1189 = vst [vmem:[#allocation3 + $0x10] sm:$0xff] %v1185_v7  ;;  %v1186_v16 = vmul.f32 %v1182_v10, %v1154_v9 }
 0x24f   : > { %1187 = vst [vmem:[#allocation3] sm:$0xff] %v1183_v12  ;;  %v1184_v6 = vmul.f32 %v1180_v15, %v1152_v13 }
 0x250   : > { %1190 = vst [vmem:[#allocation3 + $0x18] sm:$0x3f] %v1186_v16 }
 0x251   : > { %1188 = vst [vmem:[#allocation3 + $0x8] sm:$0xff] %v1184_v6 }
 0x257   : > { %v1198_v17 = vld [vmem:[#allocation3 + $0x11] ss:$2 sm:$0x3f]  ;;  %v1203_v8 = vld [vmem:[#allocation3 + $0x12] ss:$2 sm:$0x3f] }
 0x258   : > { %v1196_v18 = vld [vmem:[#allocation3 + $0x1] ss:$2 sm:$0xff]  ;;  %v1201_v19 = vld [vmem:[#allocation3 + $0x2] ss:$2 sm:$0xff] }
 0x259   : > { %v1191_v20 = vld [vmem:[#allocation3] ss:$2 sm:$0xff]  ;;  %v1199_v21 = vpack.c.bf16 %v1198_v17, %v1196_v18  ;;  %v1204_v11 = vpack.c.bf16 %v1203_v8, %v1201_v19  ;;  %v1193_v22 = vld [vmem:[#allocation3 + $0x10] ss:$2 sm:$0x3f] }
 0x25a   : > { %v1194_v23 = vpack.c.bf16 %v1193_v22, %v1191_v20 }
 0x25b   : > { %1436 = vmatprep.mubr.bf16.mxu0 %v1199_v21  ;;  %2208 = vmatmul.mubr.bf16.vlgmr.msra.gmra.mrb[12].mxu1 %v1204_v11 }
 0x25c   : > { %1437 = vmatmul.mubr.bf16.vlgmr.msra.gmra.mrb[8].mxu0 %v1194_v23  ;;  %2227 = vmatprep.mubr.msk.bf16.mxu1 %vm2383_vm1, %v2382_v56 }
 0x25d   : > { %2212 = vmatpush3.bf16.msra.mxu1 %v2321_v14  ;;  %2087 = vmatpush3.bf16.msra.mxu0 %v2322_v25  ;;  %v1962_v25 = vld [vmem:[%s2826_s8] ss:$0 sm:$0xff] }
 0x25e   : > { %2213 = vmatprep.subr.bf16.mxu1 %v2382_v56  ;;  %2088 = vmatprep.subr.bf16.mxu0 %v2323_v27 }
 0x261   : > { %2214 = vmatpush3.bf16.msra.mxu1 %v2324_v28  ;;  %2089 = vmatpush3.bf16.msra.mxu0 %v2325_v29 }
 0x262   : > { %2215 = vmatprep.subr.bf16.mxu1 %v2382_v56  ;;  %2090 = vmatprep.subr.bf16.mxu0 %v2326_v31 }
 0x265   : > { %2216 = vmatpush3.bf16.msra.mxu1 %v2327_v32  ;;  %2091 = vmatpush3.bf16.msra.mxu0 %v2328_v33 }
 0x266   : > { %2217 = vmatprep.subr.bf16.mxu1 %v2382_v56  ;;  %2092 = vmatprep.subr.bf16.mxu0 %v2329_v34 }
 0x269   : > { %2218 = vmatpush3.bf16.msra.mxu1 %v2330_v35  ;;  %2093 = vmatpush3.bf16.msra.mxu0 %v2331_v26 }
 0x26a   : > { %2219 = vmatprep.subr.bf16.mxu1 %v2382_v56  ;;  %2094 = vmatprep.subr.bf16.mxu0 %v2332_v36 }
 0x26d   : > { %2220 = vmatpush3.bf16.msra.mxu1 %v2333_v30  ;;  %2095 = vmatpush3.bf16.msra.mxu0 %v2334_v37 }
 0x26e   : > { %2221 = vmatprep.subr.bf16.mxu1 %v2382_v56  ;;  %2096 = vmatprep.subr.bf16.mxu0 %v2335_v38 }
 0x271   : > { %2222 = vmatpush3.bf16.msra.mxu1 %v2336_v39  ;;  %2097 = vmatpush3.bf16.msra.mxu0 %v2337_v40 }
 0x272   : > { %2223 = vmatprep.subr.bf16.mxu1 %v2382_v56  ;;  %2098 = vmatprep.subr.bf16.mxu0 %v2338_v41 }
 0x275   : > { %2224 = vmatpush3.bf16.msra.mxu1 %v2339_v42  ;;  %2099 = vmatpush3.bf16.msra.mxu0 %v2340_v43 }
 0x276   : > { %2225 = vmatprep.subr.bf16.mxu1 %v2382_v56  ;;  %2100 = vmatprep.subr.bf16.mxu0 %v2341_v44 }
 0x279   : > { %2226 = vmatpush3.bf16.msra.mxu1 %v2342_v45  ;;  %2101 = vmatpush3.bf16.msra.mxu0 %v2343_v46 }
 0x32e   : > { %v1479_v3 = vpop.f32.mrb[12].mxu1 }
 0x32f   : > { %v2071_v47 = vpop.f32.mrb[8].mxu0  ;;  %v2209_v48 = vpop.f32.mrb[13].mxu1 }
 0x330   : > { %v2072_v50 = vpop.f32.mrb[9].mxu0  ;;  %v1482_v51 = vpop.f32.mrb[14].mxu1 }
 0x331   : > { %v2073_v52 = vadd.f32 %v2072_v50, %v2071_v47  ;;  %v2074_v53 = vpop.f32.mrb[10].mxu0  ;;  %v2210_v54 = vpop.f32.mrb[15].mxu1 }
 0x332   : > { %v2075_v56 = vpop.f32.mrb[11].mxu0 }
 0x333   : > { %v1439_v55 = vadd.f32 %v2073_v52, %v1937_v49  ;;  %v2076_v57 = vadd.f32 %v2075_v56, %v2074_v53 }
 0x335   : > { %v1480_v58 = vadd.f32 %v1479_v3, %v1439_v55  ;;  %v1442_v59 = vadd.f32 %v2076_v57, %v1937_v49 }
 0x337   : > { %v1488_v60 = vmul.f32 %v1480_v58, %v1480_v58  ;;  %v1483_v61 = vadd.f32 %v1482_v51, %v1442_v59  ;;  %v1486_v12 = vmul.f32 0.5, %v1480_v58 }
 0x339   : > { %v1490_v62 = vmul.f32 %v1488_v60, %v1480_v58  ;;  %v1489_v63 = vmul.f32 %v1483_v61, %v1483_v61  ;;  %v1487_v6 = vmul.f32 0.5, %v1483_v61 }
 0x33b   : > { %v1492_v0 = vmul.f32 0.044715, %v1490_v62  ;;  %v1491_v1 = vmul.f32 %v1489_v63, %v1483_v61 }
 0x33d   : > { %v1494_v2 = vadd.f32 %v1492_v0, %v1480_v58  ;;  %v1493_v4 = vmul.f32 0.044715, %v1491_v1 }
 0x33f   : > { %v1496_v5 = vmul.f32 0.7978846, %v1494_v2  ;;  %v1495_v7 = vadd.f32 %v1493_v4, %v1483_v61 }
 0x341   : > { %2368 = vtanh.f32 %v1496_v5  ;;  %v1497_v9 = vmul.f32 0.7978846, %v1495_v7 }
 0x343   : > { %2370 = vtanh.f32 %v1497_v9 }
 0x34b   : > { %v2369_v10 = vpop.eup %2368 }
 0x34c   : > { %v1500_v13 = vadd.f32 1.0, %v2369_v10 }
 0x34d   : > { %v2371_v15 = vpop.eup %2370 }
 0x34e   : > { %v1502_v16 = vmul.f32 %v1500_v13, %v1486_v12  ;;  %v1501_v17 = vadd.f32 1.0, %v2371_v15 }
 0x350   : > { %1504 = vst [vmem:[#allocation4] sm:$0xff] %v1502_v16  ;;  %v1503_v8 = vmul.f32 %v1501_v17, %v1487_v6 }
 0x352   : > { %1505 = vst [vmem:[#allocation4 + $0x8] sm:$0x3f] %v1503_v8 }
 0x359   : > { %v1509_v18 = vld [vmem:[#allocation4 + $0x1] ss:$2 sm:$0x3f]  ;;  %v1512_v19 = vld [vmem:[#allocation4 + $0x2] ss:$2 sm:$0x3f] }
 0x35a   : > { %v1510_v20 = vpack.c.bf16 %v1509_v18, %v1509_v18  ;;  %v1513_v21 = vpack.c.bf16 %v1512_v19, %v1512_v19  ;;  %v1506_v11 = vld [vmem:[#allocation4] ss:$2 sm:$0x3f] }
 0x35b   : > { %v1507_v22 = vpack.c.bf16 %v1506_v11, %v1506_v11 }
 0x35c   : > { %1745 = vmatprep.mubr.bf16.mxu0 %v1510_v20  ;;  %2228 = vmatmul.mubr.bf16.vlgmr.msra.gmra.mrb[16].mxu1 %v1513_v21 }
 0x35d   : > { %1746 = vmatmul.mubr.bf16.vlgmr.msra.gmra.mrb[12].mxu0 %v1507_v22 }
 0x42f   : > { %v1787_v23 = vpop.f32.mrb[16].mxu1 }
 0x430   : > { %v2102_v24 = vpop.f32.mrb[12].mxu0  ;;  %v2229_v14 = vpop.f32.mrb[17].mxu1 }
 0x431   : > { %v2103_v27 = vpop.f32.mrb[13].mxu0  ;;  %v1790_v28 = vpop.f32.mrb[18].mxu1 }
 0x432   : > { %v2104_v29 = vadd.f32 %v2103_v27, %v2102_v24  ;;  %v2105_v31 = vpop.f32.mrb[14].mxu0  ;;  %v2230_v32 = vpop.f32.mrb[19].mxu1 }
 0x433   : > { %v2106_v33 = vpop.f32.mrb[15].mxu0 }
 0x434   : > { %v1748_v34 = vadd.f32 %v2104_v29, %v1962_v25 }
 0x436   : > { %v1788_v35 = vadd.f32 %v1787_v23, %v1748_v34 }
 0x438   : > { %v1794_v26 = vmul.f32 %v1788_v35, %v1788_v35  ;;  %v1793_v40 = vmul.f32 0.5, %v1788_v35 }
 0x43a   : > { %v1795_v36 = vmul.f32 %v1794_v26, %v1788_v35 }
 0x43c   : > { %v1796_v30 = vmul.f32 0.044715, %v1795_v36 }
 0x43e   : > { %v1797_v37 = vadd.f32 %v1796_v30, %v1788_v35 }
 0x440   : > { %v1798_v38 = vmul.f32 0.7978846, %v1797_v37 }
 0x442   : > { %2372 = vtanh.f32 %v1798_v38 }
 0x44c   : > { %v2373_v39 = vpop.eup %2372 }
 0x44d   : > { %v1800_v41 = vadd.f32 1.0, %v2373_v39 }
 0x44f   : > { %v1801_v42 = vmul.f32 %v1800_v41, %v1793_v40 }
 0x451   : > { %1802 = vst [vmem:[%s330_s11] sm:$0x3f] %v1801_v42 }
 0x452 PF: > { %s19_s30 = sadd.s32 1, %s2380_s30  }
 0x453   : > { %p16_p4 = scmp.ge.s32.totalorder %s19_s30, 4  }
 0x455   :  { %18 = sbr.rel (!%p16_p4) target bundleno = 1 (0x1), region = 106 }

</bundles_post_ra>
